<compile_context>
chip_gen: v5e
topology: v5e:2x2
jax: 0.10.0
libtpu: 0.0.40
codegen_flags: <defaults>
</compile_context>

<pallas_src>
import jax
import jax.numpy as jnp
from jax.experimental import pallas as pl
from jax.experimental.pallas import tpu as pltpu


def _forward_kernel(r_ref, x2_ref, x3_ref, x1_ref, x5_ref, x1_out_ref):
    # r comes in on the scalar (SMEM/sreg) path.
    r = r_ref[0]
    # x4 = x3 * rand(1); x5 = x2 * x4 -> two VPU multiplies, no xlane traffic.
    x5_ref[...] = x2_ref[...] * (x3_ref[...] * r)
    # The two dead `for ... x1 += 1` loops collapse to x1 + 20; computed in the
    # same kernel so the whole forward is a single device region.
    x1_out_ref[...] = x1_ref[...] + jnp.asarray(20.0, x1_ref.dtype)


def model_forward(x1, key):
    """Pallas/JAX port of Model.forward.

    Returns (x5, x1_mutated).  x5 matches the PyTorch return value.
    TODO(synk): JAX is functional, so PyTorch's in-place mutation of x1 is
    modeled by returning x1 + 20 as a second output.
    x2 / x3 / r are freshly generated per call from `key`, mirroring
    torch.randn / torch.rand_like / torch.rand being re-drawn on every call
    (different RNG stream than PyTorch, same distributions).
    """
    k2, k3, k4 = jax.random.split(key, 3)
    x2 = jax.random.normal(k2, (1, 2, 3), dtype=x1.dtype)    # torch.randn(1, 2, 3)
    x3 = jax.random.uniform(k3, x1.shape, dtype=x1.dtype)    # torch.rand_like(x1)
    r = jax.random.uniform(k4, (1,), dtype=x1.dtype)         # torch.rand(1)

    x5, x1_mutated = pl.pallas_call(
        _forward_kernel,
        out_shape=(
            jax.ShapeDtypeStruct(x2.shape, x2.dtype),   # x5
            jax.ShapeDtypeStruct(x1.shape, x1.dtype),   # mutated x1 (x1 + 20)
        ),
        in_specs=[
            pl.BlockSpec(memory_space=pltpu.MemorySpace.SMEM),   # r scalar
            pl.BlockSpec(memory_space=pltpu.MemorySpace.VMEM),   # x2
            pl.BlockSpec(memory_space=pltpu.MemorySpace.VMEM),   # x3
            pl.BlockSpec(memory_space=pltpu.MemorySpace.VMEM),   # x1
        ],
        out_specs=(
            pl.BlockSpec(memory_space=pltpu.MemorySpace.VMEM),
            pl.BlockSpec(memory_space=pltpu.MemorySpace.VMEM),
        ),
    )(r, x2, x3, x1)

    return x5, x1_mutated


if __name__ == "__main__":
    key = jax.random.PRNGKey(0)
    k_x1, k_fwd = jax.random.split(key, 2)

    # x1: shape-compatible input (see note above).
    x1 = jax.random.normal(k_x1, (1, 2, 3), dtype=jnp.float32)

    x5, x1_out = model_forward(x1, k_fwd)
    jax.block_until_ready((x5, x1_out))

    # Pure-JAX reference (re-derive the same randoms deterministically).
    k2, k3, k4 = jax.random.split(k_fwd, 3)
    ref_x2 = jax.random.normal(k2, (1, 2, 3), dtype=jnp.float32)
    ref_x3 = jax.random.uniform(k3, x1.shape, dtype=jnp.float32)
    ref_r = jax.random.uniform(k4, (1,), dtype=jnp.float32)
    ref_x5 = ref_x2 * (ref_x3 * ref_r[0])
    ref_x1 = x1 + 20.0

    assert jnp.allclose(x5, ref_x5, atol=1e-6), "x5 mismatch"
    assert jnp.allclose(x1_out, ref_x1, atol=1e-6), "x1 mismatch"

    print("KERNEL_OK")
</pallas_src>

<mosaic_0001>
module attributes {stable_mosaic.version = 11 : i64} {
  func.func @_forward_kernel(%arg0: memref<1xf32, #tpu.memory_space<smem>>, %arg1: memref<1x2x3xf32, #tpu.memory_space<vmem>>, %arg2: memref<1x2x3xf32, #tpu.memory_space<vmem>>, %arg3: memref<1x2x3xf32, #tpu.memory_space<vmem>>, %arg4: memref<1x2x3xf32, #tpu.memory_space<vmem>>, %arg5: memref<1x2x3xf32, #tpu.memory_space<vmem>>) attributes {dimension_semantics = [], scalar_prefetch = 0 : i64, scratch_operands = 0 : i64, tpu.core_type = #tpu.core_type<tc>} {
    %c0 = arith.constant 0 : index
    %0 = memref.load %arg0[%c0] : memref<1xf32, #tpu.memory_space<smem>>
    %c0_0 = arith.constant 0 : index
    %c0_1 = arith.constant 0 : index
    %c0_2 = arith.constant 0 : index
    %1 = vector.load %arg1[%c0_0, %c0_1, %c0_2] : memref<1x2x3xf32, #tpu.memory_space<vmem>>, vector<1x2x3xf32>
    %c0_3 = arith.constant 0 : index
    %c0_4 = arith.constant 0 : index
    %c0_5 = arith.constant 0 : index
    %2 = vector.load %arg2[%c0_3, %c0_4, %c0_5] : memref<1x2x3xf32, #tpu.memory_space<vmem>>, vector<1x2x3xf32>
    %3 = vector.broadcast %0 : f32 to vector<1x2x3xf32>
    %4 = arith.mulf %2, %3 : vector<1x2x3xf32>
    %5 = arith.mulf %1, %4 : vector<1x2x3xf32>
    %c0_6 = arith.constant 0 : index
    %c0_7 = arith.constant 0 : index
    %c0_8 = arith.constant 0 : index
    %6 = vector.load %arg4[%c0_6, %c0_7, %c0_8] : memref<1x2x3xf32, #tpu.memory_space<vmem>>, vector<1x2x3xf32>
    tpu.vector_store %arg4[%c0_6, %c0_7, %c0_8], %5 {strides = array<i32>} : memref<1x2x3xf32, #tpu.memory_space<vmem>>, vector<1x2x3xf32>,
    %c0_9 = arith.constant 0 : index
    %c0_10 = arith.constant 0 : index
    %c0_11 = arith.constant 0 : index
    %7 = vector.load %arg3[%c0_9, %c0_10, %c0_11] : memref<1x2x3xf32, #tpu.memory_space<vmem>>, vector<1x2x3xf32>
    %cst = arith.constant 2.000000e+01 : f32
    %8 = vector.broadcast %cst : f32 to vector<1x2x3xf32>
    %9 = arith.addf %7, %8 : vector<1x2x3xf32>
    %c0_12 = arith.constant 0 : index
    %c0_13 = arith.constant 0 : index
    %c0_14 = arith.constant 0 : index
    %10 = vector.load %arg5[%c0_12, %c0_13, %c0_14] : memref<1x2x3xf32, #tpu.memory_space<vmem>>, vector<1x2x3xf32>
    tpu.vector_store %arg5[%c0_12, %c0_13, %c0_14], %9 {strides = array<i32>} : memref<1x2x3xf32, #tpu.memory_space<vmem>>, vector<1x2x3xf32>,
    return
  }
}

</mosaic_0001>

<bundles_post_ra>
// kernel: tpu_custom_call.1
= control target key start
LH: loop header
LB: loop body
LE: loop exit
PB: predicated region body
PF: predicated region fallthrough
CT: control target
= control target key end

     0   :  { %12 = vsyncpa [#allocation4], 0  ;;  %s257_s0 = inlined_call_operand.<no memory space> [shape: f32[1], index: 0, kind: input, shape index: {}]   ;;  %s258_s1 = inlined_call_operand.vmem [shape: f32[1,2,3], index: 1, kind: input, shape index: {}]   ;;  %s259_s2 = inlined_call_operand.hbm [shape: f32[1,2,3], index: 2, kind: input, shape index: {}]   ;;  %s260_s3 = inlined_call_operand.hbm [shape: f32[1,2,3], index: 3, kind: input, shape index: {}]   ;;  %s261_s4 = inlined_call_operand.hbm [shape: f32[1,2,3], index: 4, kind: output, shape index: {0}]   ;;  %s262_s5 = inlined_call_operand.hbm [shape: f32[1,2,3], index: 5, kind: output, shape index: {1}]  }
   0x1   :  { %13 = vsyncpa [#allocation7], 0 }
   0x2   :  { %14 = vsyncpa [#allocation5], 0 }
   0x3   :  { %15 = vsyncpa [#allocation10], 0  ;;  %s25_s20 = sshll.u32 %s259_s2, 4  ;;  %s203_s21 = smov [#allocation3]   ;;  %s26_s20 = int_to_ptr.hbm [resolvable:$true] %s25_s20 }
   0x4   :  { %s27_s22 = sshll.u32 %s203_s21, 4  ;;  %s36_s25 = sshll.u32 %s260_s3, 4  ;;  %s28_s22 = int_to_ptr.vmem [resolvable:$true] %s27_s22  ;;  %s37_s25 = int_to_ptr.hbm [resolvable:$true] %s36_s25 }
   0x5   :  { %30 = dma.hbm_to_vmem [thread:$0]  %s26_s20, 32, %s28_s22, [#allocation4]  }
   0x6   :  { %s204_s26 = smov [#allocation6]  }
   0x7   :  { %s38_s27 = sshll.u32 %s204_s26, 4  ;;  %s39_s27 = int_to_ptr.vmem [resolvable:$true] %s38_s27 }
   0x8   :  { %41 = dma.hbm_to_vmem [thread:$0]  %s37_s25, 32, %s39_s27, [#allocation7]  }
   0x9   :  { %195 = dma.done.wait [#allocation4], 32  }
   0xa   :  { %196 = vsyncadd [#allocation4], 4294967264 }
   0xb   :  { %197 = dma.done.wait [#allocation7], 32  }
   0xc   :  { %198 = vsyncadd [#allocation7], 4294967264  ;;  %v53_v0 = vstv %s257_s0  ;;  %s205_s29 = smov [#allocation9]   ;;  %s79_s3 = sshll.u32 %s262_s5, 4  ;;  %vm56_vm0 = vcmask 17408   ;;  %s80_s3 = int_to_ptr.hbm [resolvable:$true] %s79_s3 }
   0xd   :  { %s77_s30 = sshll.u32 %s205_s29, 4  ;;  %s206_s8 = smov [#allocation8]   ;;  %v51_v1 = vld [vmem:[%s258_s1] sm:$0x3]  ;;  %v58_v3 = vld [vmem:[#allocation6] sm:$0x3]  ;;  %s78_s30 = int_to_ptr.vmem [resolvable:$true] %s77_s30 }
   0xe   :  { %s66_s9 = sshll.u32 %s206_s8, 4  ;;  %s68_s12 = sshll.u32 %s261_s4, 4  ;;  %v52_v2 = vld [vmem:[#allocation3] sm:$0x3]  ;;  %v59_v5 = vadd.f32 20.0, %v58_v3  ;;  %s67_s9 = int_to_ptr.vmem [resolvable:$true] %s66_s9  ;;  %s69_s12 = int_to_ptr.hbm [resolvable:$true] %s68_s12 }
   0xf   :  { %v54_v4 = vmul.f32 %v53_v0, %v52_v2 }
  0x10   :  { %60 = vst.msk [vmem:[#allocation9] sm:$0x3] %vm56_vm0, %v59_v5 }
  0x11   :  { %v55_v6 = vmul.f32 %v54_v4, %v51_v1  ;;  %82 = dma.vmem_to_hbm [thread:$0]  %s78_s30, 32, %s80_s3, [#allocation10]  }
  0x13   :  { %57 = vst.msk [vmem:[#allocation8] sm:$0x3] %vm56_vm0, %v55_v6 }
  0x14   :  { %71 = dma.vmem_to_hbm [thread:$0]  %s67_s9, 32, %s69_s12, [#allocation5]  }
  0x15   :  { %199 = dma.done.wait [#allocation5], 32  }
  0x16   :  { %200 = vsyncadd [#allocation5], 4294967264 }
  0x17   :  { %201 = dma.done.wait [#allocation10], 32  }
  0x18   :  { %202 = vsyncadd [#allocation10], 4294967264 }
  0x19   :  { %91 = vsyncpa [#allocation4], 1 }
  0x1a   :  { %92 = vsyncpa [#allocation7], 1 }
  0x1b   :  { %93 = vsyncpa [#allocation5], 1 }
  0x1c   :  { %94 = vsyncpa [#allocation10], 1 }

</bundles_post_ra>
